<compile_context>
chip_gen: v6e
topology: v6e:2x2x1
jax: 0.10.0
libtpu: 0.0.40
codegen_flags: <defaults>
</compile_context>

<pallas_src>
import functools

import jax
import jax.numpy as jnp
from jax import lax
from jax.experimental import pallas as pl
from jax.experimental.pallas import tpu as pltpu

EPS = 1e-5


def _bntt_kernel(x_ref, gamma_ref, beta_ref, out_ref, *, eps, inv_count):
    # x_ref/out_ref block: (N, 1, C, HW); gamma_ref/beta_ref block: (1, 1, C, 1).
    x = x_ref[...].astype(jnp.float32)

    # Per-channel batch statistics over N (axis 0) and H*W (axis 3, lanes).
    s = jnp.sum(jnp.sum(x, axis=3, keepdims=True), axis=0, keepdims=True)
    mean = s * inv_count                                     # (1, 1, C, 1)
    centered = x - mean
    sq = jnp.sum(jnp.sum(centered * centered, axis=3, keepdims=True),
                 axis=0, keepdims=True)
    var = sq * inv_count                                     # (1, 1, C, 1)

    gamma = gamma_ref[...].astype(jnp.float32)               # (1, 1, C, 1)
    beta = beta_ref[...].astype(jnp.float32)                 # (1, 1, C, 1)
    scale = gamma * lax.rsqrt(var + eps)                     # EUP rsqrt

    out_ref[...] = (centered * scale + beta).astype(out_ref.dtype)


def bntt(x, gamma, beta, eps=EPS):
    """x: [N, T, C, H, W]; gamma, beta: [T, C]. Returns [N, T, C, H, W]."""
    N, T, C, H, W = x.shape
    HW = H * W

    # Free, contiguous reshapes only — no transposes (native layout kept).
    x_r = x.reshape(N, T, C, HW)
    g_r = gamma.reshape(T, 1, C, 1)
    b_r = beta.reshape(T, 1, C, 1)

    kernel = functools.partial(
        _bntt_kernel, eps=float(eps), inv_count=1.0 / float(N * HW))

    out = pl.pallas_call(
        kernel,
        out_shape=jax.ShapeDtypeStruct((N, T, C, HW), x.dtype),
        grid_spec=pltpu.PrefetchScalarGridSpec(
            num_scalar_prefetch=0,
            grid=(T,),
            in_specs=[
                # Full (N, C, HW) slab for timestep t: lane-dense last dim.
                pl.BlockSpec((N, 1, C, HW), lambda t: (0, t, 0, 0)),
                # Per-timestep affine params (tiny blocks, broadcast in-kernel).
                pl.BlockSpec((1, 1, C, 1), lambda t: (t, 0, 0, 0)),
                pl.BlockSpec((1, 1, C, 1), lambda t: (t, 0, 0, 0)),
            ],
            out_specs=pl.BlockSpec((N, 1, C, HW), lambda t: (0, t, 0, 0)),
        ),
        compiler_params=pltpu.CompilerParams(
            # Each timestep is an independent BatchNorm -> parallel grid axis
            # (shardable across TensorCores on megacore parts).
            dimension_semantics=("parallel",),
        ),
    )(x_r, g_r, b_r)

    return out.reshape(N, T, C, H, W)


def bntt_ref(x, gamma, beta, eps=EPS):
    """Pure-JAX reference mirroring PyTorch train-mode BatchNorm2d per timestep."""
    xf = x.astype(jnp.float32)
    mean = jnp.mean(xf, axis=(0, 3, 4), keepdims=True)           # [1,T,C,1,1]
    var = jnp.mean(jnp.square(xf - mean), axis=(0, 3, 4), keepdims=True)
    g = gamma.astype(jnp.float32)[None, :, :, None, None]
    b = beta.astype(jnp.float32)[None, :, :, None, None]
    y = (xf - mean) * lax.rsqrt(var + eps) * g + b
    return y.astype(x.dtype)


if __name__ == "__main__":
    key = jax.random.PRNGKey(0)
    k1, k2, k3 = jax.random.split(key, 3)

    # T=6 matches the 6 BatchNorm2d layers hard-coded in the PyTorch BNTT module.
    N, T, C, H, W = 2, 6, 4, 16, 16
    x = jax.random.normal(k1, (N, T, C, H, W), dtype=jnp.float32) * 2.0 + 0.5
    gamma = 1.0 + 0.1 * jax.random.normal(k2, (T, C), dtype=jnp.float32)
    beta = 0.1 * jax.random.normal(k3, (T, C), dtype=jnp.float32)

    out = bntt(x, gamma, beta)
    out = jax.block_until_ready(out)

    ref = bntt_ref(x, gamma, beta)
    assert out.shape == (N, T, C, H, W), out.shape
    assert out.dtype == x.dtype
    assert jnp.allclose(out, ref, atol=1e-5, rtol=1e-5), float(
        jnp.max(jnp.abs(out.astype(jnp.float32) - ref.astype(jnp.float32))))

    print("KERNEL_OK")
</pallas_src>

<mosaic_0001>
module attributes {stable_mosaic.version = 11 : i64} {
  func.func @_bntt_kernel(%arg0: i32, %arg1: memref<2x1x4x256xf32, #tpu.memory_space<vmem>>, %arg2: memref<1x1x4x1xf32, #tpu.memory_space<vmem>>, %arg3: memref<1x1x4x1xf32, #tpu.memory_space<vmem>>, %arg4: memref<2x1x4x256xf32, #tpu.memory_space<vmem>>) attributes {dimension_semantics = [#tpu.dimension_semantics<parallel>], iteration_bounds = array<i64: 6>, scalar_prefetch = 0 : i64, scratch_operands = 0 : i64, tpu.core_type = #tpu.core_type<tc>, window_params = [{transform_indices = @transform_0, window_bounds = array<i64: 2, 1, 4, 256>}, {transform_indices = @transform_1, window_bounds = array<i64: 1, 1, 4, 1>}, {transform_indices = @transform_2, window_bounds = array<i64: 1, 1, 4, 1>}, {transform_indices = @transform_3, window_bounds = array<i64: 2, 1, 4, 256>}]} {
    %c0 = arith.constant 0 : index
    %c0_0 = arith.constant 0 : index
    %c0_1 = arith.constant 0 : index
    %c0_2 = arith.constant 0 : index
    %0 = vector.load %arg1[%c0, %c0_0, %c0_1, %c0_2] : memref<2x1x4x256xf32, #tpu.memory_space<vmem>>, vector<2x1x4x256xf32>
    %cst = arith.constant dense<0.000000e+00> : vector<2x1x4xf32>
    %1 = vector.multi_reduction <add>, %0, %cst [3] : vector<2x1x4x256xf32> to vector<2x1x4xf32>
    %2 = vector.shape_cast %1 : vector<2x1x4xf32> to vector<2x1x4x1xf32>
    %cst_3 = arith.constant dense<0.000000e+00> : vector<1x4x1xf32>
    %3 = vector.multi_reduction <add>, %2, %cst_3 [0] : vector<2x1x4x1xf32> to vector<1x4x1xf32>
    %4 = vector.shape_cast %3 : vector<1x4x1xf32> to vector<1x1x4x1xf32>
    %cst_4 = arith.constant 0.001953125 : f32
    %5 = vector.broadcast %cst_4 : f32 to vector<1x1x4x1xf32>
    %6 = arith.mulf %4, %5 : vector<1x1x4x1xf32>
    %7 = vector.broadcast %6 : vector<1x1x4x1xf32> to vector<2x1x4x256xf32>
    %8 = arith.subf %0, %7 : vector<2x1x4x256xf32>
    %9 = arith.mulf %8, %8 : vector<2x1x4x256xf32>
    %cst_5 = arith.constant dense<0.000000e+00> : vector<2x1x4xf32>
    %10 = vector.multi_reduction <add>, %9, %cst_5 [3] : vector<2x1x4x256xf32> to vector<2x1x4xf32>
    %11 = vector.shape_cast %10 : vector<2x1x4xf32> to vector<2x1x4x1xf32>
    %cst_6 = arith.constant dense<0.000000e+00> : vector<1x4x1xf32>
    %12 = vector.multi_reduction <add>, %11, %cst_6 [0] : vector<2x1x4x1xf32> to vector<1x4x1xf32>
    %13 = vector.shape_cast %12 : vector<1x4x1xf32> to vector<1x1x4x1xf32>
    %cst_7 = arith.constant 0.001953125 : f32
    %14 = vector.broadcast %cst_7 : f32 to vector<1x1x4x1xf32>
    %15 = arith.mulf %13, %14 : vector<1x1x4x1xf32>
    %c0_8 = arith.constant 0 : index
    %c0_9 = arith.constant 0 : index
    %c0_10 = arith.constant 0 : index
    %c0_11 = arith.constant 0 : index
    %16 = vector.load %arg2[%c0_8, %c0_9, %c0_10, %c0_11] : memref<1x1x4x1xf32, #tpu.memory_space<vmem>>, vector<1x1x4x1xf32>
    %c0_12 = arith.constant 0 : index
    %c0_13 = arith.constant 0 : index
    %c0_14 = arith.constant 0 : index
    %c0_15 = arith.constant 0 : index
    %17 = vector.load %arg3[%c0_12, %c0_13, %c0_14, %c0_15] : memref<1x1x4x1xf32, #tpu.memory_space<vmem>>, vector<1x1x4x1xf32>
    %cst_16 = arith.constant 9.99999974E-6 : f32
    %18 = vector.broadcast %cst_16 : f32 to vector<1x1x4x1xf32>
    %19 = arith.addf %15, %18 : vector<1x1x4x1xf32>
    %20 = math.rsqrt %19 : vector<1x1x4x1xf32>
    %21 = arith.mulf %16, %20 : vector<1x1x4x1xf32>
    %22 = vector.broadcast %21 : vector<1x1x4x1xf32> to vector<2x1x4x256xf32>
    %23 = arith.mulf %8, %22 : vector<2x1x4x256xf32>
    %24 = vector.broadcast %17 : vector<1x1x4x1xf32> to vector<2x1x4x256xf32>
    %25 = arith.addf %23, %24 : vector<2x1x4x256xf32>
    %c0_17 = arith.constant 0 : index
    %c0_18 = arith.constant 0 : index
    %c0_19 = arith.constant 0 : index
    %c0_20 = arith.constant 0 : index
    %26 = vector.load %arg4[%c0_17, %c0_18, %c0_19, %c0_20] : memref<2x1x4x256xf32, #tpu.memory_space<vmem>>, vector<2x1x4x256xf32>
    tpu.vector_store %arg4[%c0_17, %c0_18, %c0_19, %c0_20], %25 {strides = array<i32>} : memref<2x1x4x256xf32, #tpu.memory_space<vmem>>, vector<2x1x4x256xf32>,
    return
  }
  func.func @transform_0(%arg0: i32) -> (i32, i32, i32, i32) {
    %c0_i32 = arith.constant 0 : i32
    %c0_i32_0 = arith.constant 0 : i32
    %c0_i32_1 = arith.constant 0 : i32
    %c0_i32_2 = arith.constant 0 : i32
    return %c0_i32, %arg0, %c0_i32_0, %c0_i32_1 : i32, i32, i32, i32
  }
  func.func @transform_1(%arg0: i32) -> (i32, i32, i32, i32) {
    %c0_i32 = arith.constant 0 : i32
    %c0_i32_0 = arith.constant 0 : i32
    %c0_i32_1 = arith.constant 0 : i32
    %c0_i32_2 = arith.constant 0 : i32
    return %arg0, %c0_i32, %c0_i32_0, %c0_i32_1 : i32, i32, i32, i32
  }
  func.func @transform_2(%arg0: i32) -> (i32, i32, i32, i32) {
    %c0_i32 = arith.constant 0 : i32
    %c0_i32_0 = arith.constant 0 : i32
    %c0_i32_1 = arith.constant 0 : i32
    %c0_i32_2 = arith.constant 0 : i32
    return %arg0, %c0_i32, %c0_i32_0, %c0_i32_1 : i32, i32, i32, i32
  }
  func.func @transform_3(%arg0: i32) -> (i32, i32, i32, i32) {
    %c0_i32 = arith.constant 0 : i32
    %c0_i32_0 = arith.constant 0 : i32
    %c0_i32_1 = arith.constant 0 : i32
    %c0_i32_2 = arith.constant 0 : i32
    return %c0_i32, %arg0, %c0_i32_0, %c0_i32_1 : i32, i32, i32, i32
  }
}

</mosaic_0001>

<bundles_post_ra>
// kernel: tpu_custom_call.1
= control target key start
LH: loop header
LB: loop body
LE: loop exit
PB: predicated region body
PF: predicated region fallthrough
CT: control target
= control target key end

     0   :  { %8 = vsyncpa [#allocation3], 0  ;;  %s805_s0 = inlined_call_operand.hbm [shape: f32[2,6,4,256], index: 0, kind: input, shape index: {}]   ;;  %s806_s1 = inlined_call_operand.vmem [shape: f32[6,1,4,1], index: 1, kind: input, shape index: {}]   ;;  %s807_s2 = inlined_call_operand.vmem [shape: f32[6,1,4,1], index: 2, kind: input, shape index: {}]   ;;  %s808_s3 = inlined_call_operand.hbm [shape: f32[2,6,4,256], index: 3, kind: output, shape index: {}]  }
   0x1   :  { %10 = vsyncpa [#allocation3 + $0x1], 0 }
   0x2   :  { %11 = vsyncpa [#allocation4], 0 }
   0x3   :  { %13 = vsyncpa [#allocation4 + $0x1], 0  ;;  %s627_s12 = smov 0   ;;  %s629_s13 = smov 0  }
   0x4   :  { %s631_s14 = smov 0   ;;  %s633_s15 = smov 0  }
   0x5 LB: > { %s648_s16 = sadd.s32 4294967295, %s595_s15   ;;  %s425_s17 = sadd.s32 4294967294, %s595_s15   ;;  %s595_s15 = sphi %s633_s15, %s823_s15   ;;  %s591_s14 = sphi %s631_s14, %s822_s14   ;;  %s587_s13 = sphi %s629_s13, %s821_s13   ;;  %s583_s12 = sphi %s627_s12, %s820_s12  }
   0x6   : > { %s652_s18 = sadd.s32 1, %s595_s15   ;;  %s26_s19 = sadd.s32 1, %s591_s14 }
   0x7   : > { %s23_s20 = ssub.s32 %s595_s15, %s652_s18  ;;  %p33_p0 = scmp.ne.s32.totalorder %s591_s14, %s587_s13 }
   0x8   : > { %p24_p1 = scmp.eq.s32.totalorder %s23_s20, 0  ;;  %p34_p2 = scmp.eq.s32.totalorder %s595_s15, 0 }
   0x9   : > { %p39_p3 = scmp.ne.s32.totalorder %s587_s13, %s583_s12  ;;  %p40_p4 = scmp.eq.s32.totalorder %s648_s16, 0 }
   0xa   : > { %s664_s21 = scalar_select %p24_p1, %s591_s14, %s26_s19  }
   0xb   : > { %p666_p5 = por %p34_p2, %p33_p0  ;;  %p670_p6 = por %p40_p4, %p39_p3 }
   0xc   : > { %p115_p7 = scmp.eq.s32.totalorder %s648_s16, 5  ;;  %p121_p8 = scmp.eq.s32.totalorder %s425_s17, 5 }
   0xd   : > { %s812_s23 = scalar_select %p670_p6, 1, 0 }
   0xe   : > { %p455_p9 = scmp.lt.s32.totalorder %s595_s15, 6  ;;  %p676_p10 = por %p115_p7, %p33_p0 }
   0xf   : > { %p680_p11 = por %p121_p8, %p39_p3  ;;  %s141_s26 = sand.u32 1, %s591_s14  }
  0x10   : > { %s813_s24 = scalar_select %p676_p10, 1, 0 }
  0x11   : > { %s814_s25 = scalar_select %p680_p11, 1, 0 }
  0x12   : > { %s441_s27 = sshll.u32 %s595_s15, 7  ;;  %s428_s28 = sshll.u32 %s141_s26, 4 }
  0x13   : > { %s689_s4 = scalar_lea.hbm %s805_s0, %s441_s27  ;;  %s145_s5 = scalar_lea.vmem [#allocation2], %s428_s28 }
  0x14   : > { %s152_s6 = sshll.u32 %s145_s5, 4  ;;  %p693_p12 = pnand %p455_p9, %p666_p5  ;;  %s697_s6 = int_to_ptr.vmem [resolvable:$true] %s152_s6 }
  0x15   : > { %s700_s8 = scalar_lea.sflag [#allocation3], %s141_s26  ;;  %s503_s9 = scalar_lea.hbm %s689_s4, 256 }
  0x16   : > { %p504_p0 = scmp.ne.s32.totalorder %s689_s4, %s503_s9  ;;  %p505_p1 = pneg %p693_p12 }
  0x17   : > { %s508_s17 = scalar_lea.hbm %s805_s0, 1536  ;;  %p509_p4 = scmp.lt.s32.totalorder %s689_s4, %s805_s0 }
  0x18   : > { %p506_p2 = pnand %p505_p1, %p504_p0  ;;  %p510_p5 = scmp.lt.s32.totalorder %s508_s17, %s503_s9 }
  0x1a   : > { %p507_p3 = pneg %p506_p2  ;;  %p511_p7 = por %p510_p5, %p509_p4 }
  0x1c   : > { %p512_p8 = pnand %p511_p7, %p507_p3 }
  0x1e   : > { %515 = shalt.err (!%p512_p8)
}
  0x1f   : > { %s516_s22 = scalar_lea.vmem %s697_s6, 256  ;;  %s597_s26 = smov [#allocation2]  }
  0x20   : > { %p517_p9 = scmp.ne.s32.totalorder %s697_s6, %s516_s22  ;;  %s521_s27 = sshll.u32 %s597_s26, 4  ;;  %s522_s27 = int_to_ptr.vmem [resolvable:$false] %s521_s27 }
  0x21   : > { %s523_s28 = scalar_lea.vmem %s522_s27, 512  ;;  %p524_p2 = scmp.lt.s32.totalorder %s697_s6, %s522_s27 }
  0x22   : > { %p519_p13 = pnand %p517_p9, %p505_p1  ;;  %p525_p11 = scmp.lt.s32.totalorder %s523_s28, %s516_s22 }
  0x24   : > { %p520_p0 = pneg %p519_p13  ;;  %p526_p10 = por %p525_p11, %p524_p2 }
  0x26   : > { %p527_p6 = pnand %p526_p10, %p520_p0 }
  0x28   : > { %530 = shalt.err (!%p527_p6)
}
  0x29   : > { %s598_s29 = smov 768   ;;  %s599_s30 = smov 128  }
  0x2a   : > { %s600_s5 = smov 8   ;;  %p174_p13 = scmp.lt.s32.totalorder %s595_s15, 7 }
  0x2b   : > { %450 = dma.hbm_to_vmem [thread:$0]  (!%p693_p12), %s689_s4, 256, %s697_s6, %s700_s8, %s598_s29, %s599_s30, %s600_s5  }
  0x2c   : > { %p816_p1 = scmp.ge.s32.totalorder %s595_s15, 1 }
  0x2e   : > { %p175_p3 = pnand %p816_p1, %p174_p13 }
  0x2f   : > { %s725_s9 = sand.u32 (!%p175_p3), 1, %s587_s13   ;;  %p817_p6 = scmp.ne.s32.totalorder (!%p175_p3), %s812_s23, 0 }
  0x30   : > { %178 = sbr.rel (%p175_p3) target bundleno = 528 (0x210), region = 32  ;;  %s432_s10 = sshll.u32 (!%p175_p3), %s725_s9, 4 }
  0x31   : > { %s181_s11 = scalar_lea.sflag (!%p175_p3), [#allocation3], %s725_s9  ;;  %s184_s17 = scalar_lea.vmem (!%p175_p3), [#allocation2], %s432_s10 }
  0x35   : > { %574 = dma.done.wait (%p817_p6), %s181_s11, 256  }
  0x36   : > { %576 = vsyncadd (%p817_p6), %s181_s11, 4294967040  ;;  %vm231_vm0 = vcmask 1043456   ;;  %v223_v0 = vld [vmem:[%s184_s17] sm:$0xff]  ;;  %v224_v1 = vld [vmem:[%s184_s17 + $0x8] sm:$0xff]  ;;  %v601_v10 = vmov 839922192   ;;  %v250_v12 = vlaneseq }
  0x37   : > { %v227_v2 = vcombine.high %v223_v0, %v223_v0  ;;  %v232_v3 = vsel %vm231_vm0, %v223_v0, 0.0  ;;  %v228_v4 = vcombine.high %v224_v1, %v224_v1  ;;  %v237_v6 = vsel %vm231_vm0, %v224_v1, 0.0  ;;  %p215_p10 = scmp.lt.s32.totalorder %s648_s16, 5  ;;  %s214_s26 = scalar_lea.vmem [#allocation5], %s432_s10 }
  0x38   : > { %v248_v11 = vunpack.c.l.s4 %v601_v10  ;;  %v251_v15 = vshrl.u32 %v250_v12, 7  ;;  %v602_v35 = vmov 0   ;;  %s328_s27 = sshll.u32 %s214_s26, 4  ;;  %s442_s28 = sshll.u32 %s648_s16, 7  ;;  %s758_s27 = int_to_ptr.vmem [resolvable:$true] %s328_s27 }
  0x39   : > { %v233_v5 = vsel %vm231_vm0, %v227_v2, 0.0  ;;  %v238_v7 = vsel %vm231_vm0, %v228_v4, 0.0  ;;  %497 = vset.pattern.permute.xlu0 %v602_v35  ;;  %498 = vset.pattern.permute.xlu1 %v602_v35  ;;  %s216_s23 = scalar_select %p215_p10, %s648_s16, 5 }
  0x3a   : > { %v234_v8 = vadd.f32 %v233_v5, %v232_v3  ;;  %v239_v9 = vadd.f32 %v238_v7, %v237_v6  ;;  %v249_v14 = vunpack.c.0.s8 %v248_v11  ;;  %s763_s5 = scalar_lea.hbm %s808_s3, %s442_s28  ;;  %s315_s10 = scalar_lea.sflag [#allocation4], %s725_s9 }
  0x3b   : > { %s434_s4 = sshll.u32 %s216_s23, 2  ;;  %s531_s11 = scalar_lea.vmem %s758_s27, 256 }
  0x3c   : > { %235 = vadd.xlane.f32.xlu0 %v234_v8  ;;  %v252_v19 = vsub.s32 %v249_v14, %v251_v15  ;;  %s222_s8 = scalar_lea.vmem %s807_s2, %s434_s4  ;;  %s218_s22 = scalar_lea.vmem %s806_s1, %s434_s4 }
  0x3d   : > { %v280_v36 = vld [vmem:[%s222_s8] sm:$0xf]  ;;  %p532_p11 = scmp.ne.s32.totalorder %s758_s27, %s531_s11  ;;  %p818_p12 = scmp.ne.s32.totalorder %s813_s24, 0 }
  0x3e   : > { %v279_v44 = vld [vmem:[%s218_s22] sm:$0xf]  ;;  %s603_s16 = smov [#allocation5]  }
  0x3f   : > { %p533_p4 = pnand %p532_p11, %p818_p12  ;;  %s535_s17 = sshll.u32 %s603_s16, 4  ;;  %s536_s17 = int_to_ptr.vmem [resolvable:$false] %s535_s17 }
  0x40   : > { %240 = vadd.xlane.f32.xlu0 %v239_v9  ;;  %s537_s23 = scalar_lea.vmem %s536_s17, 512  ;;  %p538_p7 = scmp.lt.s32.totalorder %s758_s27, %s536_s17 }
  0x41   : > { %p534_p5 = pneg %p533_p4  ;;  %p539_p8 = scmp.lt.s32.totalorder %s537_s23, %s531_s11 }
  0x43   : > { %p540_p9 = por %p539_p8, %p538_p7 }
  0x45   : > { %p541_p0 = pnand %p540_p9, %p534_p5 }
  0xc5   : > { %v236_v13 = vpop.xlane.xlu0 %235 }
  0xc6   : > { %v242_v17 = vsel %vm231_vm0, %v236_v13, 0.0 }
  0xc9   : > { %v241_v16 = vpop.xlane.xlu0 %240 }
  0xca   : > { %v243_v18 = vsel %vm231_vm0, %v241_v16, 0.0 }
  0xcb   : > { %v244_v20 = vadd.f32 %v243_v18, %v242_v17 }
  0xcd   : > { %v245_v21 = vmul.f32 0.001953125, %v244_v20 }
  0xcf   : > { %v253_v22 = vrot.slane %v245_v21, %v252_v19 }
  0xd1   : > { %v256_v23 = vsub.f32 %v224_v1, %v253_v22  ;;  %v255_v24 = vsub.f32 %v223_v0, %v253_v22 }
  0xd3   : > { %v257_v25 = vmul.f32 %v255_v24, %v255_v24  ;;  %v258_v26 = vmul.f32 %v256_v23, %v256_v23 }
  0xd5   : > { %v261_v27 = vcombine.high %v257_v25, %v257_v25  ;;  %v262_v28 = vcombine.high %v258_v26, %v258_v26  ;;  %v265_v29 = vsel %vm231_vm0, %v257_v25, 0.0  ;;  %v270_v33 = vsel %vm231_vm0, %v258_v26, 0.0 }
  0xd7   : > { %v266_v30 = vsel %vm231_vm0, %v261_v27, 0.0  ;;  %v271_v32 = vsel %vm231_vm0, %v262_v28, 0.0 }
  0xd8   : > { %v267_v31 = vadd.f32 %v266_v30, %v265_v29  ;;  %v272_v34 = vadd.f32 %v271_v32, %v270_v33 }
  0xda   : > { %268 = vadd.xlane.f32.xlu1 %v267_v31 }
  0xde   : > { %273 = vadd.xlane.f32.xlu1 %v272_v34 }
  0xef   : > { %300 = vperm.xlu1 %498, %v280_v36  }
 0x163   : > { %v269_v37 = vpop.xlane.xlu1 %268 }
 0x164   : > { %v275_v39 = vsel %vm231_vm0, %v269_v37, 0.0 }
 0x167   : > { %v274_v38 = vpop.xlane.xlu1 %273 }
 0x168   : > { %v276_v40 = vsel %vm231_vm0, %v274_v38, 0.0 }
 0x169   : > { %v277_v41 = vadd.f32 %v276_v40, %v275_v39 }
 0x16b   : > { %v278_v42 = vmul.f32 0.001953125, %v277_v41  ;;  %v301_v47 = vpop.permute.xlu1 %300 }
 0x16c   : > { %v308_v50 = vrot.slane %v301_v47, %v252_v19 }
 0x16d   : > { %v281_v43 = vadd.f32 1e-05, %v278_v42 }
 0x16f   : > { %501 = vrsqrt.f32 %v281_v43 }
 0x17c   : > { %v502_v45 = vpop.eup %501 }
 0x17d   : > { %v283_v46 = vmul.f32 %v502_v45, %v279_v44 }
 0x17f   : > { %286 = vperm.xlu0 %497, %v283_v46  }
 0x1fa   : > { %v287_v48 = vpop.permute.xlu0 %286 }
 0x1fb   : > { %v294_v49 = vrot.slane %v287_v48, %v252_v19 }
 0x1fd   : > { %v296_v51 = vmul.f32 %v294_v49, %v255_v24  ;;  %v297_v52 = vmul.f32 %v294_v49, %v256_v23 }
 0x1ff   : > { %v310_v53 = vadd.f32 %v308_v50, %v296_v51  ;;  %v311_v54 = vadd.f32 %v308_v50, %v297_v52 }
 0x201   : > { %312 = vst [vmem:[%s214_s26] sm:$0xff] %v310_v53  ;;  %313 = vst [vmem:[%s214_s26 + $0x8] sm:$0xff] %v311_v54 }
 0x202   : > { %544 = shalt.err (!%p541_p0)
}
 0x203   : > { %s545_s4 = scalar_lea.hbm %s763_s5, 256  ;;  %s549_s8 = scalar_lea.hbm %s808_s3, 1536 }
 0x204   : > { %p546_p2 = scmp.ne.s32.totalorder %s763_s5, %s545_s4  ;;  %p550_p3 = scmp.lt.s32.totalorder %s763_s5, %s808_s3 }
 0x205   : > { %p551_p6 = scmp.lt.s32.totalorder %s549_s8, %s545_s4 }
 0x206   : > { %p547_p13 = pnand %p546_p2, %p818_p12 }
 0x207   : > { %p552_p10 = por %p551_p6, %p550_p3 }
 0x208   : > { %p548_p1 = pneg %p547_p13 }
 0x20a   : > { %p553_p11 = pnand %p552_p10, %p548_p1 }
 0x20c   : > { %556 = shalt.err (!%p553_p11)
}
 0x20d   : > { %s604_s22 = smov 128   ;;  %s605_s26 = smov 768  }
 0x20e   : > { %s606_s28 = smov 8  }
 0x20f   : > { %445 = dma.vmem_to_hbm [thread:$0]  (%p818_p12), %s758_s27, 256, %s763_s5, %s315_s10, %s604_s22, %s605_s26, %s606_s28  }
 0x210 PF: > { %p456_p4 = scmp.ge.s32.totalorder %s595_s15, 2  ;;  %s343_s29 = sand.u32 1, %s583_s12  }
 0x211   : > { %p819_p5 = scmp.ne.s32.totalorder %s814_s25, 0  ;;  %s344_s30 = scalar_lea.sflag [#allocation4], %s343_s29 }
 0x213   : > { %p452_p7 = pnand %p456_p4, %p819_p5 }
 0x215   : > { %p453_p8 = pneg %p452_p7 }
 0x217   : > { %578 = dma.done.wait (%p453_p8), %s344_s30, 256  }
 0x218   : > { %580 = vsyncadd (%p453_p8), %s344_s30, 4294967040  ;;  %p16_p9 = scmp.ge.s32.totalorder %s652_s18, 8   ;;  %s820_s12 = smov %s587_s13 }
 0x219   : > { %s821_s13 = smov %s591_s14  ;;  %s822_s14 = smov %s664_s21 }
 0x21a   : > { %s823_s15 = smov %s652_s18  ;;  %18 = sbr.rel (!%p16_p9) target bundleno = 5 (0x5), region = 83 }
 0x21f   :  { %349 = vsyncpa [#allocation3], 1 }
 0x220   :  { %351 = vsyncpa [#allocation3 + $0x1], 1 }
 0x221   :  { %352 = vsyncpa [#allocation4], 1 }
 0x222   :  { %354 = vsyncpa [#allocation4 + $0x1], 1 }

</bundles_post_ra>
